<compile_context>
chip_gen: v6e
topology: v6e:2x2x1
jax: 0.10.0
libtpu: 0.0.40
codegen_flags: <defaults>
</compile_context>

<pallas_src>
import jax
import jax.numpy as jnp
from jax.experimental import pallas as pl
from jax.experimental.pallas import tpu as pltpu


def _avg_encoder_kernel(x_ref, mask_ref, o_ref, acc_ref):
    """One (batch-tile, hidden-tile) output block; S is the reduction axis.

    x_ref:    (Bt, St, Ht)  native dtype (f32 / bf16)
    mask_ref: (Bt, 1,  St)  same dtype; values are 0 or 1/word_count
    o_ref:    (Bt, Ht)      output dtype
    acc_ref:  (Bt, 1, Ht)   f32 VMEM accumulator, resident across the S axis
    """
    si = pl.program_id(2)

    @pl.when(si == 0)
    def _():
        acc_ref[...] = jnp.zeros_like(acc_ref)

    # Masked, pre-normalized partial sum on the MXU:
    #   (Bt, 1, St) @ (Bt, St, Ht) -> (Bt, 1, Ht), accumulated in f32.
    acc_ref[...] += jax.lax.dot_general(
        mask_ref[...],
        x_ref[...],
        dimension_numbers=(((2,), (1,)), ((0,), (0,))),
        preferred_element_type=jnp.float32,
        precision=jax.lax.Precision.HIGHEST,
    )

    @pl.when(si == pl.num_programs(2) - 1)
    def _():
        acc = acc_ref[...]                       # (Bt, 1, Ht)
        o_ref[...] = acc[:, 0, :].astype(o_ref.dtype)


def _vmem_budget():
    """Generation-aware (scoped-VMEM limit, per-x-tile byte target)."""
    cap = None
    try:
        cap = getattr(pltpu.get_tpu_info(), "vmem_capacity_bytes", None)
    except Exception:
        cap = None
    if cap is not None and cap >= (96 << 20):    # v5e / v6e: 128 MiB physical
        return 64 << 20, 8 << 20
    if cap is not None:                           # v7x: 64 MiB per TensorCore
        return 40 << 20, 5 << 20
    return 32 << 20, 4 << 20                      # unknown: be conservative


def _choose_tiles(B, S, H, itemsize):
    """Pick (Bp, Bt, Ht, St, Sp, vmem_limit); Bp / Sp are padded extents."""
    vmem_limit, target = _vmem_budget()

    # Batch tile: the (B, H) output block needs Bt % 8 == 0 or Bt == B.  Pad B
    # up to a multiple of 8 when it is large and ragged (padded rows carry an
    # all-zero mask -> output 0, sliced off in the wrapper).
    Bp = B
    if B > 8 and B % 8:
        Bp = pl.cdiv(B, 8) * 8
    Bt = 8 if (Bp >= 8 and Bp % 8 == 0) else Bp

    # Hidden tile: split H when the batch axis alone gives no grid parallelism
    # (so v7x's second TensorCore has an independent step to run), and keep
    # halving if even a minimal S tile would blow the per-tile byte target.
    Ht = H
    if (Bp // Bt) < 2 and H % 256 == 0:
        Ht = H // 2
    min_st = min(S, 128)
    while Bt * min_st * Ht * itemsize > target and Ht % 256 == 0:
        Ht //= 2

    # Sequence tile: St is either the whole sequence or a multiple of 128, so
    # the lane-dense (Bt, 1, St) mask block and the second-minor dim of the x
    # block tile cleanly for any dtype (128 covers the 8/16/32 sublane-packing
    # granularities of f32/bf16/int8).  When tiling, S is padded to a multiple
    # of St (padded mask entries are zero, so the sum is unchanged).
    if Bt * S * Ht * itemsize <= target or S <= 128:
        St, Sp = S, S
    else:
        St = max(128, (target // (Bt * Ht * itemsize)) // 128 * 128)
        St = min(St, pl.cdiv(S, 128) * 128)
        Sp = pl.cdiv(S, St) * St

    return Bp, Bt, Ht, St, Sp, vmem_limit


def avg_encoder(inputs, input_mask):
    """Pallas equivalent of AVGEncoder.forward (dropout p=0.0 == identity).

    inputs:     (B, S, H) float32 / bfloat16
    input_mask: (B, S)    any numeric / bool dtype, treated as 0/1
    returns:    (B, H)    masked mean over S, in inputs.dtype
    """
    B, S, H = inputs.shape
    if not jnp.issubdtype(inputs.dtype, jnp.floating):
        inputs = inputs.astype(jnp.float32)
    x_dtype = inputs.dtype
    itemsize = jnp.dtype(x_dtype).itemsize

    Bp, Bt, Ht, St, Sp, vmem_limit = _choose_tiles(B, S, H, itemsize)

    # Tiny (B, S) precompute in plain JAX: fold 1 / max(word_count, 1) into the
    # mask so the kernel needs no third input stream and no finalize multiply.
    m = input_mask.astype(jnp.float32)                        # (B, S)
    count = jnp.sum(m, axis=-1, keepdims=True)                # (B, 1)
    inv_count = 1.0 / jnp.where(count == 0.0, 1.0, count)     # (B, 1)
    mask = (m * inv_count).astype(x_dtype)[:, None, :]        # (B, 1, S) lane-dense

    # Pad ragged shapes up to tile multiples; padded entries have zero mask.
    if Bp != B or Sp != S:
        inputs = jnp.pad(inputs, ((0, Bp - B), (0, Sp - S), (0, 0)))
        mask = jnp.pad(mask, ((0, Bp - B), (0, 0), (0, Sp - S)))

    grid = (Bp // Bt, H // Ht, Sp // St)   # reduction axis (S) last

    out = pl.pallas_call(
        _avg_encoder_kernel,
        out_shape=jax.ShapeDtypeStruct((Bp, H), x_dtype),
        grid=grid,
        in_specs=[
            pl.BlockSpec((Bt, St, Ht), lambda bi, hi, si: (bi, si, hi)),
            pl.BlockSpec((Bt, 1, St), lambda bi, hi, si: (bi, 0, si)),
        ],
        out_specs=pl.BlockSpec((Bt, Ht), lambda bi, hi, si: (bi, hi)),
        scratch_shapes=[pltpu.VMEM((Bt, 1, Ht), jnp.float32)],
        compiler_params=pltpu.CompilerParams(
            dimension_semantics=("parallel", "parallel", "arbitrary"),
            vmem_limit_bytes=vmem_limit,
        ),
    )(inputs, mask)

    return out[:B] if Bp != B else out


def avg_encoder_ref(inputs, input_mask):
    """Pure-JAX reference mirroring the PyTorch get_vector_mean."""
    m = input_mask.astype(jnp.float32)
    inputs_sum = jnp.sum(inputs.astype(jnp.float32) * m[:, :, None], axis=1)
    word_count = jnp.sum(m, axis=-1)
    word_count = jnp.where(word_count == 0, 1.0, word_count)[:, None]
    return (inputs_sum / word_count).astype(inputs.dtype)


if __name__ == "__main__":
    key = jax.random.PRNGKey(0)
    k_x, k_m = jax.random.split(key)

    B, S, H = 2, 8, 32  # batch, seq, embedding_size
    inputs = jax.random.normal(k_x, (B, S, H), dtype=jnp.float32)
    # 0/1 integer mask; force one row to be all zeros to exercise the
    # masked_fill(word_count == 0, 1) path.
    input_mask = (jax.random.uniform(k_m, (B, S)) > 0.3).astype(jnp.int32)
    input_mask = input_mask.at[1].set(0)

    out = avg_encoder(inputs, input_mask)
    out = jax.block_until_ready(out)

    ref = avg_encoder_ref(inputs, input_mask)
    assert out.shape == (B, H)
    assert jnp.allclose(out, ref, atol=1e-4, rtol=1e-4), "mismatch vs reference"

    print("KERNEL_OK")
</pallas_src>

<mosaic_0001>
module attributes {stable_mosaic.version = 11 : i64} {
  func.func @_avg_encoder_kernel(%arg0: i32, %arg1: i32, %arg2: i32, %arg3: memref<2x8x32xf32, #tpu.memory_space<vmem>>, %arg4: memref<2x1x8xf32, #tpu.memory_space<vmem>>, %arg5: memref<2x32xf32, #tpu.memory_space<vmem>>, %arg6: memref<2x1x32xf32, #tpu.memory_space<vmem>>) attributes {dimension_semantics = [#tpu.dimension_semantics<parallel>, #tpu.dimension_semantics<parallel>, #tpu.dimension_semantics<arbitrary>], iteration_bounds = array<i64: 1, 1, 1>, scalar_prefetch = 0 : i64, scratch_operands = 1 : i64, tpu.core_type = #tpu.core_type<tc>, window_params = [{transform_indices = @transform_0, window_bounds = array<i64: 2, 8, 32>}, {transform_indices = @transform_1, window_bounds = array<i64: 2, 1, 8>}, {transform_indices = @transform_2, window_bounds = array<i64: 2, 32>}]} {
    %c0_i32 = arith.constant 0 : i32
    %0 = arith.cmpi eq, %arg2, %c0_i32 : i32
    %1 = arith.extui %0 : i1 to i32
    %c0_i32_0 = arith.constant 0 : i32
    %2 = arith.cmpi ne, %1, %c0_i32_0 : i32
    scf.if %2 {
      %cst_14 = arith.constant 0.000000e+00 : f32
      %12 = vector.broadcast %cst_14 : f32 to vector<2x1x32xf32>
      %c0_15 = arith.constant 0 : index
      %c0_16 = arith.constant 0 : index
      %c0_17 = arith.constant 0 : index
      %13 = vector.load %arg6[%c0_15, %c0_16, %c0_17] : memref<2x1x32xf32, #tpu.memory_space<vmem>>, vector<2x1x32xf32>
      tpu.vector_store %arg6[%c0_15, %c0_16, %c0_17], %12 {strides = array<i32>} : memref<2x1x32xf32, #tpu.memory_space<vmem>>, vector<2x1x32xf32>,
    } else {
    }
    %c0 = arith.constant 0 : index
    %c0_1 = arith.constant 0 : index
    %c0_2 = arith.constant 0 : index
    %3 = vector.load %arg6[%c0, %c0_1, %c0_2] : memref<2x1x32xf32, #tpu.memory_space<vmem>>, vector<2x1x32xf32>
    %c0_3 = arith.constant 0 : index
    %c0_4 = arith.constant 0 : index
    %c0_5 = arith.constant 0 : index
    %4 = vector.load %arg4[%c0_3, %c0_4, %c0_5] : memref<2x1x8xf32, #tpu.memory_space<vmem>>, vector<2x1x8xf32>
    %c0_6 = arith.constant 0 : index
    %c0_7 = arith.constant 0 : index
    %c0_8 = arith.constant 0 : index
    %5 = vector.load %arg3[%c0_6, %c0_7, %c0_8] : memref<2x8x32xf32, #tpu.memory_space<vmem>>, vector<2x8x32xf32>
    %cst = arith.constant dense<0.000000e+00> : vector<2x1x32xf32>
    %6 = tpu.matmul %4, %5, %cst {dimension_numbers = #tpu.dot_dimension_numbers<[2], [1], [1], [2], [0, 0, 0, 1, 1, 2], [0], [0]>, precision = #tpu.contract_precision<fp32>} : vector<2x1x8xf32>, vector<2x8x32xf32>, vector<2x1x32xf32> -> vector<2x1x32xf32>
    %7 = arith.addf %3, %6 : vector<2x1x32xf32>
    %c0_9 = arith.constant 0 : index
    %c0_10 = arith.constant 0 : index
    %c0_11 = arith.constant 0 : index
    %8 = vector.load %arg6[%c0_9, %c0_10, %c0_11] : memref<2x1x32xf32, #tpu.memory_space<vmem>>, vector<2x1x32xf32>
    tpu.vector_store %arg6[%c0_9, %c0_10, %c0_11], %7 {strides = array<i32>} : memref<2x1x32xf32, #tpu.memory_space<vmem>>, vector<2x1x32xf32>,
    %c0_i32_12 = arith.constant 0 : i32
    %9 = arith.cmpi eq, %arg2, %c0_i32_12 : i32
    %10 = arith.extui %9 : i1 to i32
    %c0_i32_13 = arith.constant 0 : i32
    %11 = arith.cmpi ne, %10, %c0_i32_13 : i32
    scf.if %11 {
      %c0_14 = arith.constant 0 : index
      %c0_15 = arith.constant 0 : index
      %c0_16 = arith.constant 0 : index
      %12 = vector.load %arg6[%c0_14, %c0_15, %c0_16] : memref<2x1x32xf32, #tpu.memory_space<vmem>>, vector<2x1x32xf32>
      %13 = vector.shape_cast %12 : vector<2x1x32xf32> to vector<2x32xf32>
      %c0_17 = arith.constant 0 : index
      %c0_18 = arith.constant 0 : index
      %14 = vector.load %arg5[%c0_17, %c0_18] : memref<2x32xf32, #tpu.memory_space<vmem>>, vector<2x32xf32>
      tpu.vector_store %arg5[%c0_17, %c0_18], %13 {strides = array<i32>} : memref<2x32xf32, #tpu.memory_space<vmem>>, vector<2x32xf32>,
    } else {
    }
    return
  }
  func.func @transform_0(%arg0: i32, %arg1: i32, %arg2: i32) -> (i32, i32, i32) {
    %c0_i32 = arith.constant 0 : i32
    return %arg0, %arg2, %arg1 : i32, i32, i32
  }
  func.func @transform_1(%arg0: i32, %arg1: i32, %arg2: i32) -> (i32, i32, i32) {
    %c0_i32 = arith.constant 0 : i32
    %c0_i32_0 = arith.constant 0 : i32
    return %arg0, %c0_i32, %arg2 : i32, i32, i32
  }
  func.func @transform_2(%arg0: i32, %arg1: i32, %arg2: i32) -> (i32, i32) {
    %c0_i32 = arith.constant 0 : i32
    return %arg0, %arg1 : i32, i32
  }
}

</mosaic_0001>

<bundles_post_ra>
// kernel: tpu_custom_call.1
= control target key start
LH: loop header
LB: loop body
LE: loop exit
PB: predicated region body
PF: predicated region fallthrough
CT: control target
= control target key end

     0   :  { %7 = vsyncpa [#allocation4], 0  ;;  %s1234_s0 = inlined_call_operand.hbm [shape: f32[2,8,32], index: 0, kind: input, shape index: {}]   ;;  %s1235_s1 = inlined_call_operand.hbm [shape: f32[2,1,8], index: 1, kind: input, shape index: {}]   ;;  %s1236_s2 = inlined_call_operand.hbm [shape: f32[2,32], index: 2, kind: output, shape index: {}]  }
   0x1   :  { %8 = vsyncpa [#allocation7], 0 }
   0x2   :  { %9 = vsyncpa [#allocation5], 0  ;;  %s1158_s9 = smov [#allocation3]  }
   0x3   :  { %s15_s10 = sshll.u32 %s1158_s9, 4  ;;  %s16_s10 = int_to_ptr.vmem [resolvable:$true] %s15_s10 }
   0x4   :  { %s1100_s11 = scalar_lea.vmem %s16_s10, 256  ;;  %p1105_p1 = scmp.lt.s32.totalorder %s16_s10, %s16_s10 }
   0x5   :  { %p1101_p0 = scmp.ne.s32.totalorder %s16_s10, %s1100_s11  ;;  %p1106_p2 = scmp.lt.s32.totalorder %s1100_s11, %s1100_s11 }
   0x7   :  { %p1107_p3 = por %p1106_p2, %p1105_p1 }
   0x9   :  { %p1108_p4 = pnand %p1107_p3, %p1101_p0 }
   0xb   :  { %1111 = shalt.err (!%p1108_p4)
}
   0xc   :  { %s1159_s12 = smov 128   ;;  %s1160_s13 = smov 8  }
   0xd   :  { %21 = dma.hbm_to_vmem [thread:$0]  %s1234_s0, 256, %s16_s10, [#allocation4], %s1159_s12, %s1159_s12, %s1160_s13  }
   0xe   :  { %s1161_s16 = smov [#allocation6]  }
   0xf   :  { %s27_s17 = sshll.u32 %s1161_s16, 4  ;;  %s28_s17 = int_to_ptr.vmem [resolvable:$true] %s27_s17 }
  0x10   :  { %s1120_s18 = scalar_lea.vmem %s28_s17, 32  ;;  %p1125_p6 = scmp.lt.s32.totalorder %s28_s17, %s28_s17 }
  0x11   :  { %p1121_p5 = scmp.ne.s32.totalorder %s28_s17, %s1120_s18  ;;  %p1126_p7 = scmp.lt.s32.totalorder %s1120_s18, %s1120_s18 }
  0x13   :  { %p1127_p8 = por %p1126_p7, %p1125_p6 }
  0x15   :  { %p1128_p9 = pnand %p1127_p8, %p1121_p5 }
  0x17   :  { %1131 = shalt.err (!%p1128_p9)
}
  0x18   :  { %s1162_s19 = smov 16   ;;  %s1163_s20 = smov 1  }
  0x19   :  { %33 = dma.hbm_to_vmem [thread:$0]  %s1235_s1, 32, %s28_s17, [#allocation7], %s1162_s19, %s1162_s19, %s1163_s20  }
  0x1a   :  { %1152 = dma.done.wait [#allocation4], 256  }
  0x1b   :  { %1153 = vsyncadd [#allocation4], 4294967040 }
  0x1c   :  { %1154 = dma.done.wait [#allocation7], 32  }
  0x1d   :  { %1155 = vsyncadd [#allocation7], 4294967264  ;;  %v1164_v0 = vmov 0.0   ;;  %vm1165_vm0 = vmmov 0   ;;  %vm53_vm1 = vcmask 64512   ;;  %v51_v1 = vld [vmem:[#allocation3] sm:$0xff] }
  0x1e   :  { %1022 = vmatprep.subr.mxu0 %v1164_v0  ;;  %1027 = vmatprep.subr.mxu1 %v1164_v0  ;;  %v49_v2 = vld [vmem:[#allocation6] sm:$0x1]  ;;  %v50_v3 = vld [vmem:[#allocation6 + $0x1] sm:$0x1]  ;;  %v88_v4 = vand.u32 4294901760, %v51_v1  ;;  %v52_v7 = vld [vmem:[#allocation3 + $0x8] sm:$0xff] }
  0x1f   :  { %1024 = vmatprep.mubr.msk.f32.mxu0 %vm1165_vm0, %v1164_v0  ;;  %1029 = vmatprep.mubr.msk.f32.mxu1 %vm1165_vm0, %v1164_v0  ;;  %v55_v5 = vsel %vm53_vm1, %v49_v2, 0  ;;  %v504_v6 = vsel %vm53_vm1, %v50_v3, 0  ;;  %v537_v9 = vand.u32 4294901760, %v52_v7  ;;  %vm44_vm2 = vcmask 253952   ;;  %s1167_s0 = smov [#allocation8]  }
  0x20   :  { %v123_v8 = vand.u32 4294901760, %v55_v5  ;;  %1023 = vmatpush3.msra.mxu0 %v88_v4  ;;  %v165_v10 = vsub.f32 %v51_v1, %v88_v4  ;;  %v572_v12 = vand.u32 4294901760, %v504_v6  ;;  %45 = vst.msk [vmem:[#allocation2] sm:$0x1] %vm44_vm2, %v1164_v0  ;;  %46 = vst.msk [vmem:[#allocation2 + $0x1] sm:$0x1] %vm44_vm2, %v1164_v0  ;;  %v968_v3 = vlaneseq }
  0x21   :  { %1032 = vmatprep.subr.mxu0 %v1164_v0  ;;  %v614_v15 = vsub.f32 %v52_v7, %v537_v9  ;;  %v1166_v1 = vmov 1966171168   ;;  %s988_s1 = sshll.u32 %s1167_s0, 4  ;;  %vm980_vm3 = vcmask 254976   ;;  %s989_s1 = int_to_ptr.vmem [resolvable:$true] %s988_s1 }
  0x22   :  { %v124_v11 = vsub.f32 %v55_v5, %v123_v8  ;;  %v166_v13 = vand.u32 4294901760, %v165_v10  ;;  %v573_v18 = vsub.f32 %v504_v6, %v572_v12  ;;  %v966_v2 = vunpack.c.l.s4 %v1166_v1  ;;  %s1132_s23 = scalar_lea.vmem %s989_s1, 32  ;;  %p1137_p11 = scmp.lt.s32.totalorder %s989_s1, %s989_s1 }
  0x23   :  { %v615_v21 = vand.u32 4294901760, %v614_v15  ;;  %v969_v5 = vshrl.u32 %v968_v3, 7  ;;  %p1133_p10 = scmp.ne.s32.totalorder %s989_s1, %s1132_s23  ;;  %p1138_p12 = scmp.lt.s32.totalorder %s1132_s23, %s1132_s23 }
  0x24   :  { %v125_v14 = vand.u32 4294901760, %v124_v11  ;;  %v167_v16 = vsub.f32 %v165_v10, %v166_v13  ;;  %v574_v22 = vand.u32 4294901760, %v573_v18 }
  0x25   :  { %v616_v23 = vsub.f32 %v614_v15, %v615_v21  ;;  %p1139_p13 = por %p1138_p12, %p1137_p11 }
  0x26   :  { %v126_v17 = vsub.f32 %v124_v11, %v125_v14  ;;  %v168_v19 = vand.u32 4294901760, %v167_v16  ;;  %v575_v24 = vsub.f32 %v573_v18, %v574_v22 }
  0x27   :  { %v617_v25 = vand.u32 4294901760, %v616_v23  ;;  %v47_v41 = vld [vmem:[#allocation2] sm:$0x1]  ;;  %v48_v60 = vld [vmem:[#allocation2 + $0x1] sm:$0x1]  ;;  %p1140_p0 = pnand %p1139_p13, %p1133_p10 }
  0x28   :  { %v127_v20 = vand.u32 4294901760, %v126_v17  ;;  %1028 = vmatpush3.msra.mxu1 %v168_v19  ;;  %v576_v26 = vand.u32 4294901760, %v575_v24 }
  0x29   :  { %1030 = vmatmul.mubr.f32.vlgmr.msra.gmra.mxu1 %v123_v8  ;;  %1037 = vmatprep.subr.mxu1 %v1164_v0 }
  0x2a   :  { %1025 = vmatmul.mubr.f32.vlgmr.msra.gmra.mxu0 %v127_v20  ;;  %1038 = vmatpush3.msra.mxu1 %v88_v4 }
  0x2b   :  { %1033 = vmatpush3.msra.mxu0 %v165_v10  ;;  %1034 = vmatprep.mubr.msk.f32.mxu0 %vm1165_vm0, %v1164_v0 }
  0x2c   :  { %1039 = vmatprep.mubr.msk.f32.mxu1 %vm1165_vm0, %v1164_v0  ;;  %1042 = vmatprep.subr.mxu0 %v1164_v0 }
  0x2d   :  { %1040 = vmatmul.mubr.f32.vlgmr.msra.gmra.mxu1 %v125_v14  ;;  %1047 = vmatprep.subr.mxu1 %v1164_v0 }
  0x2e   :  { %1035 = vmatmul.mubr.f32.vlgmr.msra.gmra.mxu0 %v124_v11  ;;  %1048 = vmatpush3.msra.mxu1 %v88_v4  ;;  %v967_v4 = vunpack.c.0.s8 %v966_v2 }
  0x2f   :  { %1043 = vmatpush3.msra.mxu0 %v166_v13  ;;  %1044 = vmatprep.mubr.msk.f32.mxu0 %vm1165_vm0, %v1164_v0 }
  0x30   :  { %1049 = vmatprep.mubr.msk.f32.mxu1 %vm1165_vm0, %v1164_v0  ;;  %1052 = vmatprep.subr.mxu0 %v1164_v0  ;;  %v970_v6 = vsub.s32 %v967_v4, %v969_v5 }
  0x31   :  { %1050 = vmatmul.mubr.f32.vlgmr.msra.gmra.mxu1 %v123_v8  ;;  %1057 = vmatprep.subr.mxu1 %v1164_v0 }
  0x32   :  { %1045 = vmatmul.mubr.f32.vlgmr.msra.gmra.mxu0 %v123_v8  ;;  %1058 = vmatpush3.msra.mxu1 %v617_v25 }
  0x33   :  { %1053 = vmatpush3.msra.mxu0 %v537_v9  ;;  %1054 = vmatprep.mubr.msk.f32.mxu0 %vm1165_vm0, %v1164_v0 }
  0x34   :  { %1059 = vmatprep.mubr.msk.f32.mxu1 %vm1165_vm0, %v1164_v0  ;;  %1062 = vmatprep.subr.mxu0 %v1164_v0 }
  0x35   :  { %1060 = vmatmul.mubr.f32.vlgmr.msra.gmra.mxu1 %v572_v12  ;;  %1067 = vmatprep.subr.mxu1 %v1164_v0 }
  0x36   :  { %1055 = vmatmul.mubr.f32.vlgmr.msra.gmra.mxu0 %v576_v26  ;;  %1068 = vmatpush3.msra.mxu1 %v537_v9 }
  0x37   :  { %1063 = vmatpush3.msra.mxu0 %v614_v15  ;;  %1064 = vmatprep.mubr.msk.f32.mxu0 %vm1165_vm0, %v1164_v0 }
  0x38   :  { %1069 = vmatprep.mubr.msk.f32.mxu1 %vm1165_vm0, %v1164_v0  ;;  %1072 = vmatprep.subr.mxu0 %v1164_v0 }
  0x39   :  { %1070 = vmatmul.mubr.f32.vlgmr.msra.gmra.mxu1 %v574_v22  ;;  %1077 = vmatprep.subr.mxu1 %v1164_v0 }
  0x3a   :  { %1065 = vmatmul.mubr.f32.vlgmr.msra.gmra.mxu0 %v573_v18  ;;  %1078 = vmatpush3.msra.mxu1 %v537_v9 }
  0x3b   :  { %1073 = vmatpush3.msra.mxu0 %v615_v21  ;;  %1074 = vmatprep.mubr.msk.f32.mxu0 %vm1165_vm0, %v1164_v0 }
  0x3c   :  { %1079 = vmatprep.mubr.msk.f32.mxu1 %vm1165_vm0, %v1164_v0 }
  0x3d   :  { %1080 = vmatmul.mubr.f32.vlgmr.msra.gmra.mxu1 %v572_v12 }
  0x3e   :  { %1075 = vmatmul.mubr.f32.vlgmr.msra.gmra.mxu0 %v572_v12 }
  0xe9   :  { %v205_v28 = vpop.f32.mrf.mxu1 }
  0xea   :  { %v129_v27 = vpop.f32.mrf.mxu0 }
  0xeb   :  { %v1031_v30 = vpop.f32.mrf.mxu1  ;;  %v206_v31 = vadd.f32 %v205_v28, %v129_v27 }
  0xec   :  { %v1026_v29 = vpop.f32.mrf.mxu0 }
  0xed   :  { %v353_v33 = vpop.f32.mrf.mxu1 }
  0xee   :  { %v279_v32 = vpop.f32.mrf.mxu0 }
  0xef   :  { %v280_v34 = vadd.f32 %v279_v32, %v206_v31  ;;  %v1041_v36 = vpop.f32.mrf.mxu1 }
  0xf0   :  { %v1036_v35 = vpop.f32.mrf.mxu0 }
  0xf1   :  { %v354_v37 = vadd.f32 %v353_v33, %v280_v34  ;;  %v499_v39 = vpop.f32.mrf.mxu1 }
  0xf2   :  { %v427_v38 = vpop.f32.mrf.mxu0 }
  0xf3   :  { %v428_v40 = vadd.f32 %v427_v38, %v354_v37  ;;  %v1051_v43 = vpop.f32.mrf.mxu1 }
  0xf4   :  { %v1046_v42 = vpop.f32.mrf.mxu0 }
  0xf5   :  { %v500_v44 = vadd.f32 %v499_v39, %v428_v40  ;;  %v654_v46 = vpop.f32.mrf.mxu1 }
  0xf6   :  { %v578_v45 = vpop.f32.mrf.mxu0 }
  0xf7   :  { %v952_v47 = vadd.f32 %v500_v44, %v47_v41  ;;  %v1061_v49 = vpop.f32.mrf.mxu1  ;;  %v655_v50 = vadd.f32 %v654_v46, %v578_v45 }
  0xf8   :  { %v1056_v48 = vpop.f32.mrf.mxu0 }
  0xf9   :  { %955 = vst.msk [vmem:[#allocation2] sm:$0x1] %vm44_vm2, %v952_v47  ;;  %v802_v52 = vpop.f32.mrf.mxu1 }
  0xfa   :  { %v728_v51 = vpop.f32.mrf.mxu0 }
  0xfb   :  { %v729_v53 = vadd.f32 %v728_v51, %v655_v50  ;;  %v1071_v55 = vpop.f32.mrf.mxu1 }
  0xfc   :  { %v1066_v54 = vpop.f32.mrf.mxu0 }
  0xfd   :  { %v803_v56 = vadd.f32 %v802_v52, %v729_v53  ;;  %v948_v58 = vpop.f32.mrf.mxu1 }
  0xfe   :  { %v876_v57 = vpop.f32.mrf.mxu0 }
  0xff   :  { %v877_v59 = vadd.f32 %v876_v57, %v803_v56  ;;  %v1081_v62 = vpop.f32.mrf.mxu1 }
 0x100   :  { %v1076_v61 = vpop.f32.mrf.mxu0  ;;  %v960_v7 = vld [vmem:[#allocation2] sm:$0x1] }
 0x101   :  { %v949_v63 = vadd.f32 %v948_v58, %v877_v59 }
 0x103   :  { %v953_v0 = vadd.f32 %v949_v63, %v48_v60 }
 0x105   :  { %956 = vst.msk [vmem:[#allocation2 + $0x1] sm:$0x1] %vm44_vm2, %v953_v0 }
 0x10c   :  { %v961_v8 = vld [vmem:[#allocation2 + $0x1] sm:$0x1] }
 0x10d   :  { %v964_v9 = vcombine.low %v960_v7, %v961_v8 }
 0x10f   :  { %v971_v10 = vrot.slane %v964_v9, %v970_v6 }
 0x111   :  { %v978_v11 = vrot.slane %v971_v10, %v970_v6 }
 0x113   :  { %981 = vst.msk [vmem:[#allocation8] sm:$0x3] %vm980_vm3, %v978_v11 }
 0x114   :  { %1143 = shalt.err (!%p1140_p0)
}
 0x115   :  { %991 = dma.vmem_to_hbm [thread:$0]  %s989_s1, 32, %s1236_s2, [#allocation5]  }
 0x116   :  { %1156 = dma.done.wait [#allocation5], 32  }
 0x117   :  { %1157 = vsyncadd [#allocation5], 4294967264 }
 0x118   :  { %995 = vsyncpa [#allocation4], 1 }
 0x119   :  { %996 = vsyncpa [#allocation7], 1 }
 0x11a   :  { %997 = vsyncpa [#allocation5], 1 }

</bundles_post_ra>
